<compile_context>
chip_gen: v6e
topology: v6e:2x2x1
jax: 0.10.0
libtpu: 0.0.40
codegen_flags: <defaults>
</compile_context>

<pallas_src>
import jax
import jax.numpy as jnp
import numpy as np
from jax.experimental import pallas as pl
from jax.experimental.pallas import tpu as pltpu


# ---------------------------------------------------------------------------
# Kernels
# ---------------------------------------------------------------------------

def _transform_kernel(feat_ref, w_ref, z_ref):
    """Z_r(tile) = feat2(tile) @ W_r.  Grid: (relation, src*batch tile), all parallel."""
    z_ref[0] = jnp.dot(
        feat_ref[...], w_ref[0], preferred_element_type=jnp.float32
    ).astype(z_ref.dtype)


def _aggregate_kernel(adj_ref, z_ref, bias_ref, o_ref):
    """H(tile) = sum_k A_cat(tile, k) @ Z(k) + bias.

    Grid: (dst tile ['parallel'], K tile ['arbitrary' reduction, trailing]).
    The output block is resident across the K axis; we initialize it with the bias
    at k == 0 and accumulate directly into it (f32 output -> no extra scratch).
    """
    # TODO(synk): for real sparse graphs, prefetch per-(dst-tile, K-tile) nonzero flags
    # via PrefetchScalarGridSpec and wrap the matmul in pl.when(flag != 0) to skip
    # all-zero adjacency tiles (DMA + MXU).
    @pl.when(pl.program_id(1) == 0)
    def _():
        o_ref[...] = jnp.broadcast_to(bias_ref[...], o_ref.shape).astype(o_ref.dtype)

    adj = adj_ref[...].astype(jnp.float32)  # bf16 counts -> f32 (exact)
    o_ref[...] += jnp.dot(adj, z_ref[...], preferred_element_type=jnp.float32)


# ---------------------------------------------------------------------------
# Wrapper
# ---------------------------------------------------------------------------

def _pick_tile(total, target, align):
    """Largest tile <= target that is a multiple of `align` and divides `total`.
    Falls back to the full dimension (always a legal Pallas block)."""
    if total <= target:
        return total
    t = (target // align) * align
    while t >= align:
        if total % t == 0:
            return t
        t -= align
    return total


def rel_graph_conv(feat_nbf, adj_cat, weight, loop_weight, h_bias):
    """RelGraphConv forward.

    feat_nbf:    [N, B, F_in]            (DGL layout: nodes, bmm-batch, features)
    adj_cat:     [N_dst, R*N_src] bf16   adj_cat[d, r*N+s] = #edges s->d of type r
    weight:      [R, F_in, F_out]
    loop_weight: [F_in, F_out]
    h_bias:      [F_out]
    returns:     [N, B, F_out] float32
    """
    N, B, F_in = feat_nbf.shape
    R, F_in2, F_out = weight.shape
    assert F_in == F_in2
    assert adj_cat.shape == (N, R * N)

    # Fold the self-loop in as an extra relation: identity adjacency + loop_weight.
    eye = jnp.eye(N, dtype=adj_cat.dtype)
    adj_full = jnp.concatenate([adj_cat, eye], axis=1)                       # [N, (R+1)*N]
    w_full = jnp.concatenate([weight.astype(jnp.float32),
                              loop_weight.astype(jnp.float32)[None]], axis=0)  # [R+1, Fi, Fo]
    R1 = R + 1
    K = R1 * N
    BF_out = B * F_out

    # ---------------- Stage 1: per-relation feature transform ----------------
    feat2 = feat_nbf.reshape(N * B, F_in).astype(jnp.float32)   # free reshape (row = s*B+b)
    tile_sb = _pick_tile(N * B, 512, 8)

    z = pl.pallas_call(
        _transform_kernel,
        out_shape=jax.ShapeDtypeStruct((R1, N * B, F_out), jnp.float32),
        grid_spec=pltpu.PrefetchScalarGridSpec(
            num_scalar_prefetch=0,
            grid=(R1, (N * B) // tile_sb),
            in_specs=[
                pl.BlockSpec((tile_sb, F_in), lambda r, s: (s, 0)),
                pl.BlockSpec((1, F_in, F_out), lambda r, s: (r, 0, 0)),
            ],
            out_specs=pl.BlockSpec((1, tile_sb, F_out), lambda r, s: (r, s, 0)),
        ),
        compiler_params=pltpu.CompilerParams(
            dimension_semantics=("parallel", "parallel")),
    )(feat2, w_full)

    # [(R+1), N*B, F_out] -> [(R+1)*N, B*F_out]  (contiguous row-major, metadata-only)
    z_flat = z.reshape(K, BF_out)

    # ---------------- Stage 2: single big-K aggregation matmul ----------------
    tile_d = _pick_tile(N, 512, 16)     # dst-tile (sublane axis, bf16-safe alignment)
    tile_k = _pick_tile(K, 1024, 128)   # contraction tile (lane axis)

    bias_flat = jnp.tile(h_bias.astype(jnp.float32), B).reshape(1, BF_out)

    # VMEM budget for the resident set (double-buffered blocks) + headroom.
    adj_itemsize = jnp.dtype(adj_full.dtype).itemsize
    est = (2 * tile_d * tile_k * adj_itemsize   # adjacency tiles (double-buffered)
           + 2 * tile_k * BF_out * 4            # Z tiles
           + 2 * tile_d * BF_out * 4            # output tiles
           + BF_out * 4)                        # bias
    vmem_limit = int(min(max(2 * est, 32 * 1024 * 1024), 64 * 1024 * 1024))

    out = pl.pallas_call(
        _aggregate_kernel,
        out_shape=jax.ShapeDtypeStruct((N, BF_out), jnp.float32),
        grid_spec=pltpu.PrefetchScalarGridSpec(
            num_scalar_prefetch=0,
            grid=(N // tile_d, K // tile_k),    # dst tiles leading, reduction trailing
            in_specs=[
                pl.BlockSpec((tile_d, tile_k), lambda i, k: (i, k)),      # A_cat (bf16)
                pl.BlockSpec((tile_k, BF_out), lambda i, k: (k, 0)),      # Z_flat
                pl.BlockSpec((1, BF_out), lambda i, k: (0, 0)),           # bias
            ],
            out_specs=pl.BlockSpec((tile_d, BF_out), lambda i, k: (i, 0)),
        ),
        compiler_params=pltpu.CompilerParams(
            dimension_semantics=("parallel", "arbitrary"),
            vmem_limit_bytes=vmem_limit),
    )(adj_full, z_flat, bias_flat)

    return out.reshape(N, B, F_out)   # back to DGL layout (free reshape)


# ---------------------------------------------------------------------------
# Glue: dense relational adjacency from the edge list (plain JAX)
# ---------------------------------------------------------------------------

def build_concat_adjacency(src, dst, etype, num_rels, num_nodes, dtype=jnp.bfloat16):
    """A[d, r*N + s] = #edges s->d with relation r, relations concatenated along K.
    Counts are small integers -> exact in bf16."""
    adj = jnp.zeros((num_nodes, num_rels * num_nodes), dtype=jnp.float32)
    adj = adj.at[dst, etype * num_nodes + src].add(1.0)
    return adj.astype(dtype)


def xavier_uniform(key, shape, gain):
    # mirrors torch.nn.init.xavier_uniform_ fan computation
    if len(shape) == 2:
        fan_in, fan_out = shape[0], shape[1]
    else:  # 3D [R, F_in, F_out]
        recv = int(np.prod(shape[2:]))
        fan_in, fan_out = shape[1] * recv, shape[0] * recv
    bound = gain * np.sqrt(6.0 / (fan_in + fan_out))
    return jax.random.uniform(key, shape, minval=-bound, maxval=bound,
                              dtype=jnp.float32)


if __name__ == "__main__":
    key = jax.random.PRNGKey(0)
    k_w, k_lw, k_feat, k_src, k_dst, k_et = jax.random.split(key, 6)

    # Small shapes consistent with the module's forward.
    num_nodes = 16     # N (homogeneous graph: num_src == num_dst)
    batch = 2          # bmm middle dim: DGL feat is [N, B, F_in]
    in_feat = 16
    out_feat = 32
    num_rels = 3
    num_edges = 40

    gain = float(np.sqrt(2.0))  # calculate_gain('relu')
    weight = xavier_uniform(k_w, (num_rels, in_feat, out_feat), gain)
    loop_weight = xavier_uniform(k_lw, (in_feat, out_feat), gain)
    h_bias = jnp.zeros((out_feat,), dtype=jnp.float32)

    # DGL-style node features [N, B, F_in].
    feat_nbf = jax.random.normal(k_feat, (num_nodes, batch, in_feat), dtype=jnp.float32)

    # Random graph.
    src = jax.random.randint(k_src, (num_edges,), 0, num_nodes, dtype=jnp.int32)
    dst = jax.random.randint(k_dst, (num_edges,), 0, num_nodes, dtype=jnp.int32)
    etype = jax.random.randint(k_et, (num_edges,), 0, num_rels, dtype=jnp.int32)

    adj_cat = build_concat_adjacency(src, dst, etype, num_rels, num_nodes)

    out_nbf = rel_graph_conv(feat_nbf, adj_cat, weight, loop_weight, h_bias)
    out_nbf = jax.block_until_ready(out_nbf)

    # Pure-JAX reference of the exact edge-wise semantics (message + fn.sum).
    w_e = weight[etype]                                    # [E, F_in, F_out]
    m = jnp.einsum("ebf,efo->ebo", feat_nbf[src], w_e)     # bmm per edge
    h_ref = jnp.zeros((num_nodes, batch, out_feat), jnp.float32).at[dst].add(m)
    h_ref = h_ref + h_bias
    h_ref = h_ref + feat_nbf @ loop_weight

    np.testing.assert_allclose(np.asarray(out_nbf), np.asarray(h_ref),
                               rtol=1e-4, atol=1e-4)
    print("KERNEL_OK")
</pallas_src>

<mosaic_0001>
module attributes {stable_mosaic.version = 11 : i64} {
  func.func @_transform_kernel(%arg0: i32, %arg1: i32, %arg2: memref<32x16xf32, #tpu.memory_space<vmem>>, %arg3: memref<1x16x32xf32, #tpu.memory_space<vmem>>, %arg4: memref<1x32x32xf32, #tpu.memory_space<vmem>>) attributes {dimension_semantics = [#tpu.dimension_semantics<parallel>, #tpu.dimension_semantics<parallel>], iteration_bounds = array<i64: 4, 1>, scalar_prefetch = 0 : i64, scratch_operands = 0 : i64, tpu.core_type = #tpu.core_type<tc>, window_params = [{transform_indices = @transform_0, window_bounds = array<i64: 32, 16>}, {transform_indices = @transform_1, window_bounds = array<i64: 1, 16, 32>}, {transform_indices = @transform_2, window_bounds = array<i64: 1, 32, 32>}]} {
    %c0 = arith.constant 0 : index
    %c0_0 = arith.constant 0 : index
    %0 = vector.load %arg2[%c0, %c0_0] : memref<32x16xf32, #tpu.memory_space<vmem>>, vector<32x16xf32>
    %c0_1 = arith.constant 0 : index
    %c0_2 = arith.constant 0 : index
    %c0_3 = arith.constant 0 : index
    %1 = vector.load %arg3[%c0_1, %c0_2, %c0_3] : memref<1x16x32xf32, #tpu.memory_space<vmem>>, vector<1x16x32xf32>
    %2 = vector.shape_cast %1 : vector<1x16x32xf32> to vector<16x32xf32>
    %cst = arith.constant dense<0.000000e+00> : vector<32x32xf32>
    %3 = tpu.matmul %0, %2, %cst {dimension_numbers = #tpu.dot_dimension_numbers<[1], [0], [0], [1], [0, 0, 1, 1], [], []>} : vector<32x16xf32>, vector<16x32xf32>, vector<32x32xf32> -> vector<32x32xf32>
    %c0_4 = arith.constant 0 : index
    %c0_5 = arith.constant 0 : index
    %c0_6 = arith.constant 0 : index
    %4 = vector.load %arg4[%c0_4, %c0_5, %c0_6] : memref<1x32x32xf32, #tpu.memory_space<vmem>>, vector<1x32x32xf32>
    %5 = vector.shape_cast %4 : vector<1x32x32xf32> to vector<32x32xf32>
    %6 = vector.shape_cast %3 : vector<32x32xf32> to vector<1x32x32xf32>
    tpu.vector_store %arg4[%c0_4, %c0_5, %c0_6], %6 {strides = array<i32>} : memref<1x32x32xf32, #tpu.memory_space<vmem>>, vector<1x32x32xf32>,
    return
  }
  func.func @transform_0(%arg0: i32, %arg1: i32) -> (i32, i32) {
    %c0_i32 = arith.constant 0 : i32
    %c0_i32_0 = arith.constant 0 : i32
    return %arg1, %c0_i32 : i32, i32
  }
  func.func @transform_1(%arg0: i32, %arg1: i32) -> (i32, i32, i32) {
    %c0_i32 = arith.constant 0 : i32
    %c0_i32_0 = arith.constant 0 : i32
    %c0_i32_1 = arith.constant 0 : i32
    return %arg0, %c0_i32, %c0_i32_0 : i32, i32, i32
  }
  func.func @transform_2(%arg0: i32, %arg1: i32) -> (i32, i32, i32) {
    %c0_i32 = arith.constant 0 : i32
    %c0_i32_0 = arith.constant 0 : i32
    return %arg0, %arg1, %c0_i32 : i32, i32, i32
  }
}

</mosaic_0001>

<bundles_post_ra>
// kernel: tpu_custom_call.1
= control target key start
LH: loop header
LB: loop body
LE: loop exit
PB: predicated region body
PF: predicated region fallthrough
CT: control target
= control target key end

     0   :  { %7 = vsyncpa [#allocation3], 0  ;;  %s819_s0 = inlined_call_operand.vmem [shape: f32[32,16], index: 0, kind: input, shape index: {}]   ;;  %s820_s1 = inlined_call_operand.hbm [shape: f32[4,16,32], index: 1, kind: input, shape index: {}]   ;;  %s821_s2 = inlined_call_operand.hbm [shape: f32[4,32,32], index: 2, kind: output, shape index: {}]  }
   0x1   :  { %9 = vsyncpa [#allocation3 + $0x1], 0 }
   0x2   :  { %10 = vsyncpa [#allocation4], 0 }
   0x3   :  { %12 = vsyncpa [#allocation4 + $0x1], 0  ;;  %s662_s9 = smov 0   ;;  %s664_s10 = smov 0  }
   0x4   :  { %s666_s11 = smov 0   ;;  %s668_s12 = smov 0  }
   0x5   :  { %s670_s13 = smov 0   ;;  %s672_s14 = smov 0  }
   0x6 LB: > { %s423_s15 = sadd.s32 4294967295, %s639_s14   ;;  %s424_s16 = sadd.s32 4294967294, %s639_s14   ;;  %s639_s14 = sphi %s672_s14, %s18_s14   ;;  %s635_s13 = sphi %s670_s13, %s831_s13   ;;  %s631_s12 = sphi %s668_s12, %s830_s12   ;;  %s627_s11 = sphi %s666_s11, %s829_s11   ;;  %s623_s10 = sphi %s664_s10, %s828_s10   ;;  %s619_s9 = sphi %s662_s9, %s827_s9  }
   0x7   : > { %s30_s17 = sadd.s32 1, %s635_s13  ;;  %s63_s18 = sadd.s32 1, %s627_s11 }
   0x8   : > { %p32_p0 = scmp.ge.s32.totalorder %s30_s17, 4  ;;  %p70_p1 = scmp.ne.s32.totalorder %s627_s11, %s623_s10 }
   0x9   : > { %p71_p2 = scmp.eq.s32.totalorder %s639_s14, 0  ;;  %p76_p3 = scmp.ne.s32.totalorder %s623_s10, %s619_s9 }
   0xa   : > { %s833_s17 = smov (%p32_p0, %s30_s17), 0  ;;  %p77_p5 = scmp.eq.s32.totalorder %s423_s15, 0 }
   0xb   : > { %p703_p4 = por %p71_p2, %p70_p1  ;;  %s60_s20 = ssub.s32 %s635_s13, %s833_s17 }
   0xc   : > { %p102_p6 = scmp.eq.s32.totalorder %s423_s15, 3  ;;  %p61_p7 = scmp.eq.s32.totalorder %s60_s20, 0 }
   0xd   : > { %p709_p8 = por %p77_p5, %p76_p3  ;;  %p108_p10 = scmp.eq.s32.totalorder %s424_s16, 3 }
   0xe   : > { %p713_p9 = por %p102_p6, %p70_p1  ;;  %p477_p12 = scmp.lt.s32.totalorder %s639_s14, 4 }
   0xf   : > { %s718_s23 = scalar_select %p61_p7, %s627_s11, %s63_s18  }
  0x10   : > { %p720_p11 = por %p108_p10, %p76_p3  ;;  %s137_s25 = sand.u32 1, %s627_s11  }
  0x11   : > { %s428_s26 = sshll.u32 %s137_s25, 4  ;;  %s443_s27 = sshll.u32 %s635_s13, 8 }
  0x12   : > { %s147_s30 = scalar_lea.hbm %s820_s1, %s443_s27  ;;  %s141_s3 = scalar_lea.vmem [#allocation2], %s428_s26 }
  0x13   : > { %s148_s4 = sshll.u32 %s141_s3, 4  ;;  %p732_p13 = pnand %p477_p12, %p703_p4  ;;  %s149_s4 = int_to_ptr.vmem [resolvable:$true] %s148_s4 }
  0x14   : > { %p431_p0 = scmp.ge.s32.totalorder %s639_s14, 1  ;;  %s138_s6 = scalar_lea.sflag [#allocation3], %s137_s25 }
  0x15   : > { %p533_p1 = pneg %p732_p13  ;;  %s544_s7 = scalar_lea.vmem %s149_s4, 256 }
  0x16   : > { %p545_p2 = scmp.ne.s32.totalorder %s149_s4, %s544_s7  ;;  %s641_s8 = smov [#allocation2]  }
  0x17   : > { %s549_s15 = sshll.u32 %s641_s8, 4  ;;  %s550_s15 = int_to_ptr.vmem [resolvable:$false] %s549_s15 }
  0x18   : > { %p547_p3 = pnand %p545_p2, %p533_p1  ;;  %s551_s16 = scalar_lea.vmem %s550_s15, 512 }
  0x19   : > { %p552_p6 = scmp.lt.s32.totalorder %s149_s4, %s550_s15  ;;  %p553_p7 = scmp.lt.s32.totalorder %s551_s16, %s544_s7 }
  0x1a   : > { %p548_p5 = pneg %p547_p3 }
  0x1b   : > { %p554_p10 = por %p553_p7, %p552_p6 }
  0x1d   : > { %p555_p4 = pnand %p554_p10, %p548_p5 }
  0x1f   : > { %558 = shalt.err (!%p555_p4)
}
  0x20   : > { %s642_s18 = smov 128   ;;  %s643_s19 = smov 8  }
  0x21   : > { %472 = dma.hbm_to_vmem [thread:$0]  (!%p732_p13), %s147_s30, 256, %s149_s4, %s138_s6, %s642_s18, %s642_s18, %s643_s19  }
  0x22   : > { %p156_p12 = scmp.lt.s32.totalorder %s639_s14, 5 }
  0x24   : > { %p157_p1 = pnand %p431_p0, %p156_p12 }
  0x25   : > { %s745_s20 = sand.u32 (!%p157_p1), 1, %s623_s10  }
  0x26   : > { %160 = sbr.rel (%p157_p1) target bundleno = 259 (0x103), region = 28  ;;  %s432_s25 = sshll.u32 (!%p157_p1), %s745_s20, 4 }
  0x27   : > { %s163_s26 = scalar_lea.sflag (!%p157_p1), [#allocation3], %s745_s20  ;;  %s166_s27 = scalar_lea.vmem (!%p157_p1), [#allocation2], %s432_s25 }
  0x2b   : > { %610 = dma.done.wait (%p709_p8), %s163_s26, 256  }
  0x2c   : > { %612 = vsyncadd (%p709_p8), %s163_s26, 4294967040  ;;  %v204_v0 = vld [vmem:[%s166_s27 + $0x8] sm:$0xff]  ;;  %v203_v1 = vld [vmem:[%s166_s27] sm:$0xff]  ;;  %vm205_vm0 = vcmask 130048   ;;  %s433_s7 = sshll.u32 %s745_s20, 5  ;;  %s444_s16 = sshll.u32 %s631_s12, 9 }
  0x2d   : > { %451 = vmatprep.subr.mxu0 %v204_v0  ;;  %461 = vmatprep.subr.mxu1 %v204_v0  ;;  %v199_v2 = vld [vmem:[%s819_s0] sm:$0xff]  ;;  %v201_v3 = vld [vmem:[%s819_s0 + $0x10] sm:$0xff]  ;;  %v200_v4 = vld [vmem:[%s819_s0 + $0x8] sm:$0xff]  ;;  %s191_s8 = scalar_lea.vmem [#allocation5], %s433_s7  ;;  %vm303_vm1 = vcmask 261120   ;;  %s772_s25 = scalar_lea.hbm %s821_s2, %s444_s16 }
  0x2e   : > { %452 = vmatpush3.msra.mxu0 %v204_v0  ;;  %463 = vmatpush3.msra.mxu1 %v204_v0  ;;  %v202_v5 = vld [vmem:[%s819_s0 + $0x18] sm:$0xff]  ;;  %s324_s15 = sshll.u32 %s191_s8, 4  ;;  %s309_s12 = scalar_lea.sflag [#allocation4], %s745_s20  ;;  %s767_s15 = int_to_ptr.vmem [resolvable:$true] %s324_s15 }
  0x2f   : > { %453 = vmatprep.subr.mxu0 %v203_v1  ;;  %462 = vmatprep.subr.mxu1 %v203_v1  ;;  %s559_s26 = scalar_lea.vmem %s767_s15, 512  ;;  %s644_s27 = smov [#allocation5]  }
  0x30   : > { %454 = vmatpush3.msra.mxu0 %v203_v1  ;;  %464 = vmatpush3.msra.mxu1 %v203_v1  ;;  %p560_p8 = scmp.ne.s32.totalorder %s767_s15, %s559_s26  ;;  %s563_s28 = sshll.u32 %s644_s27, 4  ;;  %s564_s28 = int_to_ptr.vmem [resolvable:$false] %s563_s28 }
  0x31   : > { %455 = vmatprep.mubr.msk.f32.mxu0 %vm205_vm0, %v199_v2  ;;  %458 = vmatprep.mubr.msk.f32.mxu1 %vm205_vm0, %v201_v3  ;;  %s565_s29 = scalar_lea.vmem %s564_s28, 1024  ;;  %p566_p2 = scmp.lt.s32.totalorder %s767_s15, %s564_s28 }
  0x32   : > { %456 = vmatmul.mubr.msk.f32.vlgmr.msra.gmra.mxu0 %vm205_vm0, %v200_v4  ;;  %459 = vmatmul.mubr.msk.f32.vlgmr.msra.gmra.mxu1 %vm205_vm0, %v202_v5  ;;  %p561_p13 = pnand %p560_p8, %p713_p9  ;;  %p567_p3 = scmp.lt.s32.totalorder %s565_s29, %s559_s26 }
  0x34   : > { %p562_p0 = pneg %p561_p13  ;;  %p568_p5 = por %p567_p3, %p566_p2 }
  0x36   : > { %p569_p6 = pnand %p568_p5, %p562_p0 }
  0xf2   : > { %v457_v6 = vpop.f32.mrf.mxu0  ;;  %v460_v7 = vpop.f32.mrf.mxu1 }
  0xf3   : > { %305 = vst.msk [vmem:[%s191_s8 + $0x8] sm:$0xff] %vm303_vm1, %v457_v6  ;;  %307 = vst.msk [vmem:[%s191_s8 + $0x18] sm:$0xff] %vm303_vm1, %v460_v7 }
  0xf4   : > { %v284_v8 = vpop.f32.mrf.mxu0  ;;  %v294_v9 = vpop.f32.mrf.mxu1 }
  0xf5   : > { %304 = vst.msk [vmem:[%s191_s8] sm:$0xff] %vm303_vm1, %v284_v8  ;;  %306 = vst.msk [vmem:[%s191_s8 + $0x10] sm:$0xff] %vm303_vm1, %v294_v9 }
  0xf6   : > { %572 = shalt.err (!%p569_p6)
}
  0xf7   : > { %s573_s30 = scalar_lea.hbm %s772_s25, 512  ;;  %s577_s4 = scalar_lea.hbm %s821_s2, 2048 }
  0xf8   : > { %p574_p7 = scmp.ne.s32.totalorder %s772_s25, %s573_s30  ;;  %p578_p12 = scmp.lt.s32.totalorder %s772_s25, %s821_s2 }
  0xf9   : > { %p579_p1 = scmp.lt.s32.totalorder %s577_s4, %s573_s30 }
  0xfa   : > { %p575_p10 = pnand %p574_p7, %p713_p9 }
  0xfb   : > { %p580_p8 = por %p579_p1, %p578_p12 }
  0xfc   : > { %p576_p4 = pneg %p575_p10 }
  0xfe   : > { %p581_p13 = pnand %p580_p8, %p576_p4 }
 0x100   : > { %584 = shalt.err (!%p581_p13)
}
 0x101   : > { %s645_s7 = smov 128   ;;  %s646_s8 = smov 8  }
 0x102   : > { %467 = dma.vmem_to_hbm [thread:$0]  (%p713_p9), %s767_s15, 512, %s772_s25, %s309_s12, %s645_s7, %s645_s7, %s646_s8  }
 0x103 PF: > { %p478_p0 = scmp.ge.s32.totalorder %s639_s14, 2  ;;  %s339_s16 = sand.u32 1, %s619_s9  }
 0x104   : > { %s340_s18 = scalar_lea.sflag [#allocation4], %s339_s16 }
 0x105   : > { %p474_p2 = pnand %p478_p0, %p720_p11 }
 0x107   : > { %p475_p3 = pneg %p474_p2 }
 0x109   : > { %614 = dma.done.wait (%p475_p3), %s340_s18, 512  }
 0x10a   : > { %616 = vsyncadd (%p475_p3), %s340_s18, 4294966784  ;;  %s18_s14 = sadd.s32 1, %s639_s14   ;;  %s827_s9 = smov %s623_s10 }
 0x10b   : > { %p15_p5 = scmp.ge.s32.totalorder %s18_s14, 6   ;;  %s828_s10 = smov %s627_s11 }
 0x10c   : > { %s829_s11 = smov %s718_s23  ;;  %s830_s12 = smov %s635_s13 }
 0x10d   : > { %s831_s13 = smov %s833_s17  ;;  %17 = sbr.rel (!%p15_p5) target bundleno = 6 (0x6), region = 76 }
 0x112   :  { %345 = vsyncpa [#allocation3], 1 }
 0x113   :  { %347 = vsyncpa [#allocation3 + $0x1], 1 }
 0x114   :  { %348 = vsyncpa [#allocation4], 1 }
 0x115   :  { %350 = vsyncpa [#allocation4 + $0x1], 1 }

</bundles_post_ra>
